<compile_context>
chip_gen: v7x
topology: tpu7x:2x2x1
jax: 0.10.0
libtpu: 0.0.40
codegen_flags: <defaults>
</compile_context>

<pallas_src>
import functools

import jax
import jax.numpy as jnp
from jax.experimental import pallas as pl
from jax.experimental.pallas import tpu as pltpu


_INV_SQRT2 = 0.7071067811865476


def _gelu_exact(x):
    # PyTorch nn.GELU() default: 0.5 * x * (1 + erf(x / sqrt(2)))
    return 0.5 * x * (1.0 + jax.lax.erf(x * _INV_SQRT2))


def _type_embedding_kernel(x_ref, w1_ref, b1_ref, w2_ref, b2_ref, o_ref):
    # x_ref:  (TM, seq_len)        VMEM tile of the flattened input rows
    # w1_ref: (seq_len, hidden)    full weight (transposed vs torch), grid-invariant
    # b1_ref: (1, hidden)
    # w2_ref: (hidden, out_dim)
    # b2_ref: (1, out_dim)
    # o_ref:  (TM, out_dim)        true-width output tile (masked vst if out_dim<128)
    #
    # Keep all math in f32 regardless of operand dtypes (matches the f32 PyTorch
    # reference; avoids a silent bf16 downcast between the two dots if weights are
    # supplied in bf16).
    x = x_ref[...].astype(jnp.float32)
    h = jnp.dot(x, w1_ref[...].astype(jnp.float32),
                preferred_element_type=jnp.float32) + b1_ref[...].astype(jnp.float32)
    h = _gelu_exact(h)
    o = jnp.dot(h, w2_ref[...].astype(jnp.float32),
                preferred_element_type=jnp.float32) + b2_ref[...].astype(jnp.float32)
    o_ref[...] = o.astype(o_ref.dtype)


def _round_up(x, n):
    return (x + n - 1) // n * n


@functools.partial(jax.jit, static_argnames=("tm",))
def type_embedding_forward(x, w1, b1, w2, b2, *, tm=1024):
    """x: [..., seq_len]; w1: [seq_len, hidden]; w2: [hidden, output]."""
    seq_len = x.shape[-1]
    hidden = w1.shape[1]
    out_dim = w2.shape[1]
    lead_shape = x.shape[:-1]

    x2d = x.reshape(-1, seq_len)
    m = x2d.shape[0]

    # ---- Row tiling ---------------------------------------------------------
    # Big tiles (multiple of 8 sublanes), clamped to the row count. No padding:
    # the partial last block is masked by Pallas.
    tm_eff = min(_round_up(tm, 8), _round_up(m, 8))
    # v7x megacore: keep >= 2 grid blocks when there is enough work to split, so
    # ("parallel",) shards rows across both TensorCores (harmless on v5e/v6e).
    if m >= 512:
        tm_eff = min(tm_eff, _round_up(-(-m // 2), 8))
    grid = (pl.cdiv(m, tm_eff),)

    b1_2d = b1.reshape(1, hidden)
    b2_2d = b2.reshape(1, out_dim)

    # ---- Scoped-VMEM budget: actual need + small headroom -------------------
    dbytes = 4
    tile_bytes = tm_eff * (seq_len + hidden + out_dim) * dbytes      # x tile + f32 h + out tile
    weight_bytes = (seq_len * hidden + hidden + hidden * out_dim + out_dim) * dbytes
    vmem_limit = int(2 * tile_bytes + 2 * weight_bytes + (4 << 20))

    out2d = pl.pallas_call(
        _type_embedding_kernel,
        out_shape=jax.ShapeDtypeStruct((m, out_dim), x.dtype),
        grid_spec=pltpu.PrefetchScalarGridSpec(
            num_scalar_prefetch=0,
            grid=grid,
            in_specs=[
                pl.BlockSpec((tm_eff, seq_len), lambda i: (i, 0)),
                # Grid-invariant operands (constant index_map): the pipeline
                # re-uses the resident VMEM copy, no re-DMA per step.
                pl.BlockSpec((seq_len, hidden), lambda i: (0, 0)),
                pl.BlockSpec((1, hidden), lambda i: (0, 0)),
                pl.BlockSpec((hidden, out_dim), lambda i: (0, 0)),
                pl.BlockSpec((1, out_dim), lambda i: (0, 0)),
            ],
            # True out_dim lanes (full-extent last dim): masked stores when
            # out_dim < 128, but ~8x fewer HBM write bytes than lane-padding.
            out_specs=pl.BlockSpec((tm_eff, out_dim), lambda i: (i, 0)),
        ),
        compiler_params=pltpu.CompilerParams(
            dimension_semantics=("parallel",),
            vmem_limit_bytes=vmem_limit),
    )(x2d, w1, b1_2d, w2, b2_2d)

    return out2d.reshape(*lead_shape, out_dim)


def init_params(key, seq_len, hidden_dim, output_dim, dtype=jnp.float32):
    """Deterministic init mimicking nn.Linear's uniform(-1/sqrt(fan_in), ...)."""
    k1, k2, k3, k4 = jax.random.split(key, 4)
    bound1 = 1.0 / float(seq_len) ** 0.5
    bound2 = 1.0 / float(hidden_dim) ** 0.5
    # torch Linear weight is (out, in); we store it transposed as (in, out).
    w1 = jax.random.uniform(k1, (seq_len, hidden_dim), dtype, -bound1, bound1)
    b1 = jax.random.uniform(k2, (hidden_dim,), dtype, -bound1, bound1)
    w2 = jax.random.uniform(k3, (hidden_dim, output_dim), dtype, -bound2, bound2)
    b2 = jax.random.uniform(k4, (output_dim,), dtype, -bound2, bound2)
    return w1, b1, w2, b2


if __name__ == "__main__":
    seq_len, hidden_dim, output_dim = 8, 32, 16

    key = jax.random.PRNGKey(0)
    kx1, kx2, kp = jax.random.split(key, 3)
    w1, b1, w2, b2 = init_params(kp, seq_len, hidden_dim, output_dim)

    def ref_forward(x):
        h = jnp.dot(x, w1) + b1
        h = 0.5 * h * (1.0 + jax.lax.erf(h * _INV_SQRT2))
        return jnp.dot(h, w2) + b2

    # Case 1: small leading shape (batch=2, nodes=8 -> M=16), single block.
    x1 = jax.random.normal(kx1, (2, 8, seq_len), jnp.float32)
    out1 = jax.block_until_ready(type_embedding_forward(x1, w1, b1, w2, b2))
    assert out1.shape == (2, 8, output_dim)
    assert jnp.allclose(out1, ref_forward(x1), atol=1e-5, rtol=1e-5)

    # Case 2: ragged M (3*37=111 rows) with tm=64 -> 2-block parallel grid and a
    # masked partial last block (no wrapper-side padding or slicing).
    x2 = jax.random.normal(kx2, (3, 37, seq_len), jnp.float32)
    out2 = jax.block_until_ready(type_embedding_forward(x2, w1, b1, w2, b2, tm=64))
    assert out2.shape == (3, 37, output_dim)
    assert jnp.allclose(out2, ref_forward(x2), atol=1e-5, rtol=1e-5)

    print("KERNEL_OK")
</pallas_src>

<mosaic_0001>
module attributes {stable_mosaic.version = 11 : i64} {
  func.func @_type_embedding_kernel(%arg0: i32, %arg1: memref<16x8xf32, #tpu.memory_space<vmem>>, %arg2: memref<8x32xf32, #tpu.memory_space<vmem>>, %arg3: memref<1x32xf32, #tpu.memory_space<vmem>>, %arg4: memref<32x16xf32, #tpu.memory_space<vmem>>, %arg5: memref<1x16xf32, #tpu.memory_space<vmem>>, %arg6: memref<16x16xf32, #tpu.memory_space<vmem>>) attributes {dimension_semantics = [#tpu.dimension_semantics<parallel>], iteration_bounds = array<i64: 1>, scalar_prefetch = 0 : i64, scratch_operands = 0 : i64, tpu.core_type = #tpu.core_type<tc>, window_params = [{transform_indices = @transform_0, window_bounds = array<i64: 16, 8>}, {pipeline_mode = #tpu.pipeline_mode<synchronous>, transform_indices = @transform_1, window_bounds = array<i64: 8, 32>}, {pipeline_mode = #tpu.pipeline_mode<synchronous>, transform_indices = @transform_2, window_bounds = array<i64: 1, 32>}, {pipeline_mode = #tpu.pipeline_mode<synchronous>, transform_indices = @transform_3, window_bounds = array<i64: 32, 16>}, {pipeline_mode = #tpu.pipeline_mode<synchronous>, transform_indices = @transform_4, window_bounds = array<i64: 1, 16>}, {transform_indices = @transform_5, window_bounds = array<i64: 16, 16>}]} {
    %c0 = arith.constant 0 : index
    %c0_0 = arith.constant 0 : index
    %0 = vector.load %arg1[%c0, %c0_0] : memref<16x8xf32, #tpu.memory_space<vmem>>, vector<16x8xf32>
    %c0_1 = arith.constant 0 : index
    %c0_2 = arith.constant 0 : index
    %1 = vector.load %arg2[%c0_1, %c0_2] : memref<8x32xf32, #tpu.memory_space<vmem>>, vector<8x32xf32>
    %cst = arith.constant dense<0.000000e+00> : vector<16x32xf32>
    %2 = tpu.matmul %0, %1, %cst {dimension_numbers = #tpu.dot_dimension_numbers<[1], [0], [0], [1], [0, 0, 1, 1], [], []>} : vector<16x8xf32>, vector<8x32xf32>, vector<16x32xf32> -> vector<16x32xf32>
    %c0_3 = arith.constant 0 : index
    %c0_4 = arith.constant 0 : index
    %3 = vector.load %arg3[%c0_3, %c0_4] : memref<1x32xf32, #tpu.memory_space<vmem>>, vector<1x32xf32>
    %4 = vector.broadcast %3 : vector<1x32xf32> to vector<16x32xf32>
    %5 = arith.addf %2, %4 : vector<16x32xf32>
    %cst_5 = arith.constant 5.000000e-01 : f32
    %6 = vector.broadcast %cst_5 : f32 to vector<16x32xf32>
    %7 = arith.mulf %6, %5 : vector<16x32xf32>
    %cst_6 = arith.constant 0.707106769 : f32
    %8 = vector.broadcast %cst_6 : f32 to vector<16x32xf32>
    %9 = arith.mulf %5, %8 : vector<16x32xf32>
    %10 = math.erf %9 : vector<16x32xf32>
    %cst_7 = arith.constant 1.000000e+00 : f32
    %11 = vector.broadcast %cst_7 : f32 to vector<16x32xf32>
    %12 = arith.addf %11, %10 : vector<16x32xf32>
    %13 = arith.mulf %7, %12 : vector<16x32xf32>
    %c0_8 = arith.constant 0 : index
    %c0_9 = arith.constant 0 : index
    %14 = vector.load %arg4[%c0_8, %c0_9] : memref<32x16xf32, #tpu.memory_space<vmem>>, vector<32x16xf32>
    %cst_10 = arith.constant dense<0.000000e+00> : vector<16x16xf32>
    %15 = tpu.matmul %13, %14, %cst_10 {dimension_numbers = #tpu.dot_dimension_numbers<[1], [0], [0], [1], [0, 0, 1, 1], [], []>} : vector<16x32xf32>, vector<32x16xf32>, vector<16x16xf32> -> vector<16x16xf32>
    %c0_11 = arith.constant 0 : index
    %c0_12 = arith.constant 0 : index
    %16 = vector.load %arg5[%c0_11, %c0_12] : memref<1x16xf32, #tpu.memory_space<vmem>>, vector<1x16xf32>
    %17 = vector.broadcast %16 : vector<1x16xf32> to vector<16x16xf32>
    %18 = arith.addf %15, %17 : vector<16x16xf32>
    %c0_13 = arith.constant 0 : index
    %c0_14 = arith.constant 0 : index
    %19 = vector.load %arg6[%c0_13, %c0_14] : memref<16x16xf32, #tpu.memory_space<vmem>>, vector<16x16xf32>
    tpu.vector_store %arg6[%c0_13, %c0_14], %18 {strides = array<i32>} : memref<16x16xf32, #tpu.memory_space<vmem>>, vector<16x16xf32>,
    return
  }
  func.func @transform_0(%arg0: i32) -> (i32, i32) {
    %c0_i32 = arith.constant 0 : i32
    %c0_i32_0 = arith.constant 0 : i32
    return %arg0, %c0_i32 : i32, i32
  }
  func.func @transform_1(%arg0: i32) -> (i32, i32) {
    %c0_i32 = arith.constant 0 : i32
    %c0_i32_0 = arith.constant 0 : i32
    %c0_i32_1 = arith.constant 0 : i32
    return %c0_i32, %c0_i32_0 : i32, i32
  }
  func.func @transform_2(%arg0: i32) -> (i32, i32) {
    %c0_i32 = arith.constant 0 : i32
    %c0_i32_0 = arith.constant 0 : i32
    %c0_i32_1 = arith.constant 0 : i32
    return %c0_i32, %c0_i32_0 : i32, i32
  }
  func.func @transform_3(%arg0: i32) -> (i32, i32) {
    %c0_i32 = arith.constant 0 : i32
    %c0_i32_0 = arith.constant 0 : i32
    %c0_i32_1 = arith.constant 0 : i32
    return %c0_i32, %c0_i32_0 : i32, i32
  }
  func.func @transform_4(%arg0: i32) -> (i32, i32) {
    %c0_i32 = arith.constant 0 : i32
    %c0_i32_0 = arith.constant 0 : i32
    %c0_i32_1 = arith.constant 0 : i32
    return %c0_i32, %c0_i32_0 : i32, i32
  }
  func.func @transform_5(%arg0: i32) -> (i32, i32) {
    %c0_i32 = arith.constant 0 : i32
    %c0_i32_0 = arith.constant 0 : i32
    return %arg0, %c0_i32 : i32, i32
  }
}

</mosaic_0001>

<bundles_post_ra>
// kernel: type_embedding_forward.1
= control target key start
LH: loop header
LB: loop body
LE: loop exit
PB: predicated region body
PF: predicated region fallthrough
CT: control target
= control target key end

     0   :  { %vm31_vm0 = vcmask 64512   ;;  %s377_s0 = inlined_call_operand.vmem [shape: f32[16,8], index: 0, kind: input, shape index: {}]   ;;  %s378_s1 = inlined_call_operand.vmem [shape: f32[8,32], index: 1, kind: input, shape index: {}]   ;;  %s379_s2 = inlined_call_operand.vmem [shape: f32[1,32], index: 2, kind: input, shape index: {}]   ;;  %s380_s3 = inlined_call_operand.vmem [shape: f32[32,16], index: 3, kind: input, shape index: {}]   ;;  %s381_s4 = inlined_call_operand.vmem [shape: f32[1,16], index: 4, kind: input, shape index: {}]   ;;  %s382_s5 = inlined_call_operand.hbm [shape: f32[16,16], index: 5, kind: output, shape index: {}]  }
   0x1   :  { %v23_v0 = vld [vmem:[%s378_s1] sm:$0xff]  ;;  %v22_v2 = vld [vmem:[%s377_s0 + $0x8] sm:$0xff] }
   0x2   :  { %v21_v1 = vld [vmem:[%s377_s0] sm:$0xff]  ;;  %250 = vmatprep.subr.mxu0 %v23_v0 }
   0x3   :  { %252 = vmatprep.mubr.msk.f32.mxu0 %vm31_vm0, %v21_v1 }
   0x4   :  { %10 = vsyncpa [#allocation3], 0  ;;  %251 = vmatpush3.msra.mxu0 %v23_v0  ;;  %v123_v3 = vld [vmem:[%s380_s3] sm:$0xff]  ;;  %v124_v4 = vld [vmem:[%s380_s3 + $0x8] sm:$0xff]  ;;  %vm134_vm1 = vcmask 261120   ;;  %s305_s7 = smov [#allocation2]  }
   0x5   :  { %253 = vmatmul.mubr.msk.f32.vlgmr.msra.gmra.mrb[0].mxu0 %vm31_vm0, %v22_v2  ;;  %v266_v5 = vpack.c.bf16 %v124_v4, %v123_v3  ;;  %v125_v6 = vld [vmem:[%s380_s3 + $0x10] sm:$0xff]  ;;  %v126_v7 = vld [vmem:[%s380_s3 + $0x18] sm:$0xff]  ;;  %v235_v9 = vld [vmem:[%s379_s2] ss:$0 sm:$0xff]  ;;  %s224_s8 = sshll.u32 %s305_s7, 4  ;;  %vm216_vm2 = vcmask 130048   ;;  %s225_s8 = int_to_ptr.vmem [resolvable:$true] %s224_s8 }
   0x6   :  { %v270_v8 = vpack.c.bf16 %v126_v7, %v125_v6  ;;  %v238_v24 = vld [vmem:[%s381_s4] ss:$0 sm:$0xff]  ;;  %s281_s9 = scalar_lea.vmem %s225_s8, 256  ;;  %p286_p1 = scmp.lt.s32.totalorder %s225_s8, %s225_s8 }
   0x7   :  { %267 = vmatprep.subr.bf16.mxu1 %v266_v5  ;;  %p282_p0 = scmp.ne.s32.totalorder %s225_s8, %s281_s9  ;;  %p287_p2 = scmp.lt.s32.totalorder %s281_s9, %s281_s9 }
   0x8   :  { %269 = vmatpush3.bf16.msra.mxu1 %v266_v5 }
   0x9   :  { %271 = vmatprep.subr.bf16.mxu1 %v270_v8  ;;  %p288_p3 = por %p287_p2, %p286_p1 }
   0xb   :  { %p289_p4 = pnand %p288_p3, %p282_p0 }
   0xc   :  { %273 = vmatpush3.bf16.msra.mxu1 %v270_v8 }
  0xd8   :  { %v254_v10 = vpop.f32.mrb[0].mxu0 }
  0xd9   :  { %v110_v11 = vadd.f32 %v254_v10, %v235_v9  ;;  %v104_v12 = vpop.f32.mrb[1].mxu0 }
  0xda   :  { %v105_v13 = vadd.f32 %v235_v9, %v104_v12 }
  0xdb   :  { %v116_v14 = vmul.f32 0.70710677, %v110_v11  ;;  %v114_v21 = vmul.f32 0.5, %v110_v11 }
  0xdc   :  { %v115_v15 = vmul.f32 0.70710677, %v105_v13  ;;  %v113_v19 = vmul.f32 0.5, %v105_v13 }
  0xdd   :  { %277 = verf.f32 %v116_v14 }
  0xde   :  { %279 = verf.f32 %v115_v15 }
  0xe7   :  { %v278_v16 = vpop.eup %277 }
  0xe8   :  { %v280_v17 = vpop.eup %279  ;;  %v120_v18 = vadd.f32 1.0, %v278_v16 }
  0xe9   :  { %v119_v20 = vadd.f32 1.0, %v280_v17 }
  0xea   :  { %v122_v23 = vmul.f32 %v120_v18, %v114_v21 }
  0xeb   :  { %v121_v22 = vmul.f32 %v119_v20, %v113_v19 }
  0xed   :  { %263 = vmatprep.mubr.msk.f32.mxu1 %vm134_vm1, %v121_v22 }
  0xee   :  { %264 = vmatmul.mubr.msk.f32.vlgmr.msra.gmra.mrb[0].mxu1 %vm134_vm1, %v122_v23 }
 0x1c1   :  { %v265_v25 = vpop.f32.mrb[0].mxu1 }
 0x1c2   :  { %v213_v26 = vadd.f32 %v265_v25, %v238_v24  ;;  %v207_v27 = vpop.f32.mrb[1].mxu1 }
 0x1c3   :  { %v208_v28 = vadd.f32 %v238_v24, %v207_v27 }
 0x1c4   :  { %218 = vst.msk [vmem:[#allocation2 + $0x8] sm:$0xff] %vm216_vm2, %v213_v26 }
 0x1c5   :  { %217 = vst.msk [vmem:[#allocation2] sm:$0xff] %vm216_vm2, %v208_v28 }
 0x1c6   :  { %292 = shalt.err (!%p289_p4)
}
 0x1c7   :  { %s293_s4 = scalar_lea.hbm %s382_s5, 256 }
 0x1c8   :  { %p294_p5 = scmp.ne.s32.totalorder %s382_s5, %s293_s4  ;;  %p297_p6 = scmp.lt.u32.totalorder %s293_s4, %s382_s5 }
 0x1ca   :  { %p299_p7 = pnand %p297_p6, %p294_p5 }
 0x1cc   :  { %302 = shalt.err (!%p299_p7)
}
 0x1cd   :  { %s306_s16 = smov 128   ;;  %s307_s17 = smov 8  }
 0x1ce   :  { %230 = dma.vmem_to_hbm [thread:$0]  %s225_s8, 256, %s382_s5, [#allocation3], %s306_s16, %s306_s16, %s307_s17  }
 0x1cf   :  { %303 = dma.done.wait [#allocation3], 256  }
 0x1d0   :  { %304 = vsyncadd [#allocation3], 4294967040 }
 0x1d1   :  { %234 = vsyncpa [#allocation3], 1 }

</bundles_post_ra>
